<compile_context>
chip_gen: v5e
topology: v5e:2x2
jax: 0.10.0
libtpu: 0.0.40
codegen_flags: <defaults>
</compile_context>

<pallas_src>
import jax
import jax.numpy as jnp
from jax.experimental import pallas as pl
from jax.experimental.pallas import tpu as pltpu


def _round_up(x, m):
    return ((x + m - 1) // m) * m


def _choose_tile(N, tn):
    """Batch (lane) tile: a single full block for small N, otherwise a
    multiple of 128 capped so the grid has at least 2 steps (v7x megacore)."""
    if N <= 256:
        return N                                    # block dim == full array dim
    half = _round_up(pl.cdiv(N, 2), 128)
    return max(128, min(tn, half))


def _ord_cl_kernel(x_ref, w1, b1, w2, b2, w3, b3, w4, b4,
                   tri_ref, diff_ref, first_ref, last_ref, out_ref):
    x = x_ref[...]                                              # (d, TN) f32

    def lin(w_ref, h, b_ref):
        # W @ h + b  — W is (out, in), b is (out, 1); lane-dense activations.
        return jnp.dot(w_ref[...], h,
                       preferred_element_type=jnp.float32) + b_ref[...]

    # 3 hidden sigmoid layers + linear head -> raw threshold params (K-1, TN)
    g = jax.nn.sigmoid(lin(w1, x, b1))                          # (M, TN)
    g = jax.nn.sigmoid(lin(w2, g, b2))                          # (M, TN)
    g = jax.nn.sigmoid(lin(w3, g, b3))                          # (M, TN)
    tmp = lin(w4, g, b4)                                        # (K-1, TN)

    # e[0,:] = tmp[0,:];  e[k,:] = exp(tmp[k,:]) for k >= 1.
    # Clamp before exp so an overflow can't poison the cumsum matmul (inf*0).
    first = first_ref[...]                                      # (K-1, 1)
    e = first * tmp + (1.0 - first) * jnp.exp(jnp.minimum(tmp, 80.0))

    # thresholds[k,:] = tmp[0,:] + sum_{1<=j<=k} exp(tmp[j,:])
    #                 = inclusive cumsum over rows, as a lower-triangular-ones
    #                   matmul (resident constant, MXU has huge slack).
    thresh = jnp.dot(tri_ref[...], e,
                     preferred_element_type=jnp.float32)        # (K-1, TN)
    sig = jax.nn.sigmoid(thresh)                                # (K-1, TN)

    # With +/-1e6 padding, sigmoid(pad) is exactly 0 / 1, so:
    #   pro[0,:]   = sig[0,:]
    #   pro[k,:]   = sig[k,:] - sig[k-1,:]        (1 <= k <= K-2)
    #   pro[K-1,:] = 1 - sig[K-2,:]
    # Expressed as  pro = D @ sig + onehot_last  (resident constants,
    # no concat / slice, lane-dense unmasked stores).
    pro = jnp.dot(diff_ref[...], sig,
                  preferred_element_type=jnp.float32) + last_ref[...]
    out_ref[...] = pro.astype(out_ref.dtype)                    # (K, TN)


def ord_cl_forward(x, params, K, tn=2048):
    """Pallas ORD_CL forward.

    x: (N, d) float32 (batch-major, as the PyTorch module receives it).
    params: weights in PyTorch nn.Linear layout (out, in); biases (out, 1).
    Returns (N, K) probabilities.
    """
    N, d = x.shape
    M = params["w1"].shape[0]
    Km1 = K - 1

    # Lane-dense layout: batch goes on the 128-lane axis inside the kernel.
    # TODO(synk): if the upstream producer can emit x as (d, N) (and/or bf16 on
    # v6e/v7x), consume that directly and drop this wrapper transpose.
    xt = x.T                                                    # (d, N)

    tn_eff = _choose_tile(N, tn)
    grid = (pl.cdiv(N, tn_eff),)                                # partial last block OK

    # Tiny resident constants (hoisted out of the per-step kernel body).
    f32 = jnp.float32
    r = jnp.arange(Km1)
    rk = jnp.arange(K)
    tri = (r[:, None] >= r[None, :]).astype(f32)                # (K-1, K-1) lower-tri ones
    diff = (rk[:, None] == r[None, :]).astype(f32) \
         - ((rk[:, None] - 1) == r[None, :]).astype(f32)        # (K, K-1) diff matrix
    first = (r == 0).astype(f32)[:, None]                       # (K-1, 1)
    last = (rk == K - 1).astype(f32)[:, None]                   # (K, 1)

    full = lambda shape: pl.BlockSpec(shape, lambda i: (0, 0))

    in_specs = [pl.BlockSpec((d, tn_eff), lambda i: (0, i))]    # x, tiled over lanes
    args = [xt]
    for layer, (fin, fout) in zip(("1", "2", "3", "4"),
                                  ((d, M), (M, M), (M, M), (M, Km1))):
        in_specs += [full((fout, fin)), full((fout, 1))]        # weight, bias (resident)
        args += [params[f"w{layer}"], params[f"b{layer}"]]
    in_specs += [full((Km1, Km1)), full((K, Km1)),
                 full((Km1, 1)), full((K, 1))]                  # tri, diff, first, last
    args += [tri, diff, first, last]

    out_spec = pl.BlockSpec((K, tn_eff), lambda i: (0, i))      # lane-dense output

    fn = pl.pallas_call(
        _ord_cl_kernel,
        out_shape=jax.ShapeDtypeStruct((K, N), jnp.float32),
        grid_spec=pltpu.PrefetchScalarGridSpec(
            num_scalar_prefetch=0,
            grid=grid,
            in_specs=in_specs,
            out_specs=out_spec,
        ),
        compiler_params=pltpu.CompilerParams(
            dimension_semantics=("parallel",),
        ),
    )
    out = fn(*args)                                             # (K, N)
    return out.T                                                # (N, K)


def ord_cl_reference(x, params, K):
    """Plain-JAX reference mirroring the PyTorch forward (same param layout)."""
    def lin(h, w, b):
        return h @ w.T + b.T
    g = jax.nn.sigmoid(lin(x, params["w1"], params["b1"]))
    g = jax.nn.sigmoid(lin(g, params["w2"], params["b2"]))
    g = jax.nn.sigmoid(lin(g, params["w3"], params["b3"]))
    tmp = lin(g, params["w4"], params["b4"])                    # (N, K-1)
    e = jnp.concatenate([tmp[:, :1], jnp.exp(tmp[:, 1:])], axis=1)
    thresh = jnp.cumsum(e, axis=1)                              # (N, K-1)
    big = 10.0 ** 6
    ones = jnp.ones((x.shape[0], 1), jnp.float32)
    padded = jnp.concatenate([-big * ones, thresh, big * ones], axis=1)
    return jax.nn.sigmoid(padded[:, 1:]) - jax.nn.sigmoid(padded[:, :-1])


def init_params(key, d, M, K):
    """N(0, 0.1) init matching the PyTorch __init__.
    Weights stored as (out, in) (nn.Linear layout); biases as (out, 1)."""
    params = {}
    layer_dims = {"1": (d, M), "2": (M, M), "3": (M, M), "4": (M, K - 1)}
    for layer, (fin, fout) in layer_dims.items():
        key, kw, kb = jax.random.split(key, 3)
        params[f"w{layer}"] = 0.1 * jax.random.normal(kw, (fout, fin), jnp.float32)
        params[f"b{layer}"] = 0.1 * jax.random.normal(kb, (fout, 1), jnp.float32)
    return params


if __name__ == "__main__":
    d, M, K = 8, 32, 6

    key = jax.random.PRNGKey(0)
    key, kp = jax.random.split(key)
    params = init_params(kp, d, M, K)

    # Case 1: tiny batch -> single full block (block dims == array dims).
    # Case 2: batch > 256 -> multi-step grid with a partial last block
    #         (exercises the pad-free partial-block path and megacore split).
    for N in (16, 300):
        key, kx = jax.random.split(key)
        x = jax.random.normal(kx, (N, d), jnp.float32)

        out = jax.block_until_ready(ord_cl_forward(x, params, K))
        ref = ord_cl_reference(x, params, K)

        assert out.shape == (N, K)
        assert jnp.allclose(out, ref, rtol=1e-3, atol=1e-5), f"mismatch (N={N})"
        # rows must sum to 1 (telescoping sigmoid differences)
        assert jnp.allclose(jnp.sum(out, axis=1), jnp.ones((N,)), atol=1e-5)

    print("KERNEL_OK")
</pallas_src>

<mosaic_0001>
module attributes {stable_mosaic.version = 11 : i64} {
  func.func @_ord_cl_kernel(%arg0: i32, %arg1: memref<8x16xf32, #tpu.memory_space<vmem>>, %arg2: memref<32x8xf32, #tpu.memory_space<vmem>>, %arg3: memref<32x1xf32, #tpu.memory_space<vmem>>, %arg4: memref<32x32xf32, #tpu.memory_space<vmem>>, %arg5: memref<32x1xf32, #tpu.memory_space<vmem>>, %arg6: memref<32x32xf32, #tpu.memory_space<vmem>>, %arg7: memref<32x1xf32, #tpu.memory_space<vmem>>, %arg8: memref<5x32xf32, #tpu.memory_space<vmem>>, %arg9: memref<5x1xf32, #tpu.memory_space<vmem>>, %arg10: memref<5x5xf32, #tpu.memory_space<vmem>>, %arg11: memref<6x5xf32, #tpu.memory_space<vmem>>, %arg12: memref<5x1xf32, #tpu.memory_space<vmem>>, %arg13: memref<6x1xf32, #tpu.memory_space<vmem>>, %arg14: memref<6x16xf32, #tpu.memory_space<vmem>>) attributes {dimension_semantics = [#tpu.dimension_semantics<parallel>], iteration_bounds = array<i64: 1>, scalar_prefetch = 0 : i64, scratch_operands = 0 : i64, tpu.core_type = #tpu.core_type<tc>, window_params = [{transform_indices = @transform_0, window_bounds = array<i64: 8, 16>}, {pipeline_mode = #tpu.pipeline_mode<synchronous>, transform_indices = @transform_1, window_bounds = array<i64: 32, 8>}, {pipeline_mode = #tpu.pipeline_mode<synchronous>, transform_indices = @transform_2, window_bounds = array<i64: 32, 1>}, {pipeline_mode = #tpu.pipeline_mode<synchronous>, transform_indices = @transform_3, window_bounds = array<i64: 32, 32>}, {pipeline_mode = #tpu.pipeline_mode<synchronous>, transform_indices = @transform_4, window_bounds = array<i64: 32, 1>}, {pipeline_mode = #tpu.pipeline_mode<synchronous>, transform_indices = @transform_5, window_bounds = array<i64: 32, 32>}, {pipeline_mode = #tpu.pipeline_mode<synchronous>, transform_indices = @transform_6, window_bounds = array<i64: 32, 1>}, {pipeline_mode = #tpu.pipeline_mode<synchronous>, transform_indices = @transform_7, window_bounds = array<i64: 5, 32>}, {pipeline_mode = #tpu.pipeline_mode<synchronous>, transform_indices = @transform_8, window_bounds = array<i64: 5, 1>}, {pipeline_mode = #tpu.pipeline_mode<synchronous>, transform_indices = @transform_9, window_bounds = array<i64: 5, 5>}, {pipeline_mode = #tpu.pipeline_mode<synchronous>, transform_indices = @transform_10, window_bounds = array<i64: 6, 5>}, {pipeline_mode = #tpu.pipeline_mode<synchronous>, transform_indices = @transform_11, window_bounds = array<i64: 5, 1>}, {pipeline_mode = #tpu.pipeline_mode<synchronous>, transform_indices = @transform_12, window_bounds = array<i64: 6, 1>}, {transform_indices = @transform_13, window_bounds = array<i64: 6, 16>}]} {
    %c0 = arith.constant 0 : index
    %c0_0 = arith.constant 0 : index
    %0 = vector.load %arg1[%c0, %c0_0] : memref<8x16xf32, #tpu.memory_space<vmem>>, vector<8x16xf32>
    %c0_1 = arith.constant 0 : index
    %c0_2 = arith.constant 0 : index
    %1 = vector.load %arg2[%c0_1, %c0_2] : memref<32x8xf32, #tpu.memory_space<vmem>>, vector<32x8xf32>
    %cst = arith.constant dense<0.000000e+00> : vector<32x16xf32>
    %2 = tpu.matmul %1, %0, %cst {dimension_numbers = #tpu.dot_dimension_numbers<[1], [0], [0], [1], [0, 0, 1, 1], [], []>} : vector<32x8xf32>, vector<8x16xf32>, vector<32x16xf32> -> vector<32x16xf32>
    %c0_3 = arith.constant 0 : index
    %c0_4 = arith.constant 0 : index
    %3 = vector.load %arg3[%c0_3, %c0_4] : memref<32x1xf32, #tpu.memory_space<vmem>>, vector<32x1xf32>
    %4 = vector.broadcast %3 : vector<32x1xf32> to vector<32x16xf32>
    %5 = arith.addf %2, %4 : vector<32x16xf32>
    %6 = arith.negf %5 : vector<32x16xf32>
    %7 = math.exp %6 : vector<32x16xf32>
    %cst_5 = arith.constant 1.000000e+00 : f32
    %8 = vector.broadcast %cst_5 : f32 to vector<32x16xf32>
    %9 = arith.addf %8, %7 : vector<32x16xf32>
    %10 = arith.divf %8, %9 : vector<32x16xf32>
    %c0_6 = arith.constant 0 : index
    %c0_7 = arith.constant 0 : index
    %11 = vector.load %arg4[%c0_6, %c0_7] : memref<32x32xf32, #tpu.memory_space<vmem>>, vector<32x32xf32>
    %cst_8 = arith.constant dense<0.000000e+00> : vector<32x16xf32>
    %12 = tpu.matmul %11, %10, %cst_8 {dimension_numbers = #tpu.dot_dimension_numbers<[1], [0], [0], [1], [0, 0, 1, 1], [], []>} : vector<32x32xf32>, vector<32x16xf32>, vector<32x16xf32> -> vector<32x16xf32>
    %c0_9 = arith.constant 0 : index
    %c0_10 = arith.constant 0 : index
    %13 = vector.load %arg5[%c0_9, %c0_10] : memref<32x1xf32, #tpu.memory_space<vmem>>, vector<32x1xf32>
    %14 = vector.broadcast %13 : vector<32x1xf32> to vector<32x16xf32>
    %15 = arith.addf %12, %14 : vector<32x16xf32>
    %16 = arith.negf %15 : vector<32x16xf32>
    %17 = math.exp %16 : vector<32x16xf32>
    %cst_11 = arith.constant 1.000000e+00 : f32
    %18 = vector.broadcast %cst_11 : f32 to vector<32x16xf32>
    %19 = arith.addf %18, %17 : vector<32x16xf32>
    %20 = arith.divf %18, %19 : vector<32x16xf32>
    %c0_12 = arith.constant 0 : index
    %c0_13 = arith.constant 0 : index
    %21 = vector.load %arg6[%c0_12, %c0_13] : memref<32x32xf32, #tpu.memory_space<vmem>>, vector<32x32xf32>
    %cst_14 = arith.constant dense<0.000000e+00> : vector<32x16xf32>
    %22 = tpu.matmul %21, %20, %cst_14 {dimension_numbers = #tpu.dot_dimension_numbers<[1], [0], [0], [1], [0, 0, 1, 1], [], []>} : vector<32x32xf32>, vector<32x16xf32>, vector<32x16xf32> -> vector<32x16xf32>
    %c0_15 = arith.constant 0 : index
    %c0_16 = arith.constant 0 : index
    %23 = vector.load %arg7[%c0_15, %c0_16] : memref<32x1xf32, #tpu.memory_space<vmem>>, vector<32x1xf32>
    %24 = vector.broadcast %23 : vector<32x1xf32> to vector<32x16xf32>
    %25 = arith.addf %22, %24 : vector<32x16xf32>
    %26 = arith.negf %25 : vector<32x16xf32>
    %27 = math.exp %26 : vector<32x16xf32>
    %cst_17 = arith.constant 1.000000e+00 : f32
    %28 = vector.broadcast %cst_17 : f32 to vector<32x16xf32>
    %29 = arith.addf %28, %27 : vector<32x16xf32>
    %30 = arith.divf %28, %29 : vector<32x16xf32>
    %c0_18 = arith.constant 0 : index
    %c0_19 = arith.constant 0 : index
    %31 = vector.load %arg8[%c0_18, %c0_19] : memref<5x32xf32, #tpu.memory_space<vmem>>, vector<5x32xf32>
    %cst_20 = arith.constant dense<0.000000e+00> : vector<5x16xf32>
    %32 = tpu.matmul %31, %30, %cst_20 {dimension_numbers = #tpu.dot_dimension_numbers<[1], [0], [0], [1], [0, 0, 1, 1], [], []>} : vector<5x32xf32>, vector<32x16xf32>, vector<5x16xf32> -> vector<5x16xf32>
    %c0_21 = arith.constant 0 : index
    %c0_22 = arith.constant 0 : index
    %33 = vector.load %arg9[%c0_21, %c0_22] : memref<5x1xf32, #tpu.memory_space<vmem>>, vector<5x1xf32>
    %34 = vector.broadcast %33 : vector<5x1xf32> to vector<5x16xf32>
    %35 = arith.addf %32, %34 : vector<5x16xf32>
    %c0_23 = arith.constant 0 : index
    %c0_24 = arith.constant 0 : index
    %36 = vector.load %arg12[%c0_23, %c0_24] : memref<5x1xf32, #tpu.memory_space<vmem>>, vector<5x1xf32>
    %37 = vector.broadcast %36 : vector<5x1xf32> to vector<5x16xf32>
    %38 = arith.mulf %37, %35 : vector<5x16xf32>
    %cst_25 = arith.constant 1.000000e+00 : f32
    %39 = vector.broadcast %cst_25 : f32 to vector<5x1xf32>
    %40 = arith.subf %39, %36 : vector<5x1xf32>
    %cst_26 = arith.constant 8.000000e+01 : f32
    %41 = vector.broadcast %cst_26 : f32 to vector<5x16xf32>
    %42 = arith.minimumf %35, %41 : vector<5x16xf32>
    %43 = math.exp %42 : vector<5x16xf32>
    %44 = vector.broadcast %40 : vector<5x1xf32> to vector<5x16xf32>
    %45 = arith.mulf %44, %43 : vector<5x16xf32>
    %46 = arith.addf %38, %45 : vector<5x16xf32>
    %c0_27 = arith.constant 0 : index
    %c0_28 = arith.constant 0 : index
    %47 = vector.load %arg10[%c0_27, %c0_28] : memref<5x5xf32, #tpu.memory_space<vmem>>, vector<5x5xf32>
    %cst_29 = arith.constant dense<0.000000e+00> : vector<5x16xf32>
    %48 = tpu.matmul %47, %46, %cst_29 {dimension_numbers = #tpu.dot_dimension_numbers<[1], [0], [0], [1], [0, 0, 1, 1], [], []>} : vector<5x5xf32>, vector<5x16xf32>, vector<5x16xf32> -> vector<5x16xf32>
    %49 = arith.negf %48 : vector<5x16xf32>
    %50 = math.exp %49 : vector<5x16xf32>
    %cst_30 = arith.constant 1.000000e+00 : f32
    %51 = vector.broadcast %cst_30 : f32 to vector<5x16xf32>
    %52 = arith.addf %51, %50 : vector<5x16xf32>
    %53 = arith.divf %51, %52 : vector<5x16xf32>
    %c0_31 = arith.constant 0 : index
    %c0_32 = arith.constant 0 : index
    %54 = vector.load %arg11[%c0_31, %c0_32] : memref<6x5xf32, #tpu.memory_space<vmem>>, vector<6x5xf32>
    %cst_33 = arith.constant dense<0.000000e+00> : vector<6x16xf32>
    %55 = tpu.matmul %54, %53, %cst_33 {dimension_numbers = #tpu.dot_dimension_numbers<[1], [0], [0], [1], [0, 0, 1, 1], [], []>} : vector<6x5xf32>, vector<5x16xf32>, vector<6x16xf32> -> vector<6x16xf32>
    %c0_34 = arith.constant 0 : index
    %c0_35 = arith.constant 0 : index
    %56 = vector.load %arg13[%c0_34, %c0_35] : memref<6x1xf32, #tpu.memory_space<vmem>>, vector<6x1xf32>
    %57 = vector.broadcast %56 : vector<6x1xf32> to vector<6x16xf32>
    %58 = arith.addf %55, %57 : vector<6x16xf32>
    %c0_36 = arith.constant 0 : index
    %c0_37 = arith.constant 0 : index
    %59 = vector.load %arg14[%c0_36, %c0_37] : memref<6x16xf32, #tpu.memory_space<vmem>>, vector<6x16xf32>
    tpu.vector_store %arg14[%c0_36, %c0_37], %58 {strides = array<i32>} : memref<6x16xf32, #tpu.memory_space<vmem>>, vector<6x16xf32>,
    return
  }
  func.func @transform_0(%arg0: i32) -> (i32, i32) {
    %c0_i32 = arith.constant 0 : i32
    %c0_i32_0 = arith.constant 0 : i32
    return %c0_i32, %arg0 : i32, i32
  }
  func.func @transform_1(%arg0: i32) -> (i32, i32) {
    %c0_i32 = arith.constant 0 : i32
    %c0_i32_0 = arith.constant 0 : i32
    %c0_i32_1 = arith.constant 0 : i32
    return %c0_i32, %c0_i32_0 : i32, i32
  }
  func.func @transform_2(%arg0: i32) -> (i32, i32) {
    %c0_i32 = arith.constant 0 : i32
    %c0_i32_0 = arith.constant 0 : i32
    %c0_i32_1 = arith.constant 0 : i32
    return %c0_i32, %c0_i32_0 : i32, i32
  }
  func.func @transform_3(%arg0: i32) -> (i32, i32) {
    %c0_i32 = arith.constant 0 : i32
    %c0_i32_0 = arith.constant 0 : i32
    %c0_i32_1 = arith.constant 0 : i32
    return %c0_i32, %c0_i32_0 : i32, i32
  }
  func.func @transform_4(%arg0: i32) -> (i32, i32) {
    %c0_i32 = arith.constant 0 : i32
    %c0_i32_0 = arith.constant 0 : i32
    %c0_i32_1 = arith.constant 0 : i32
    return %c0_i32, %c0_i32_0 : i32, i32
  }
  func.func @transform_5(%arg0: i32) -> (i32, i32) {
    %c0_i32 = arith.constant 0 : i32
    %c0_i32_0 = arith.constant 0 : i32
    %c0_i32_1 = arith.constant 0 : i32
    return %c0_i32, %c0_i32_0 : i32, i32
  }
  func.func @transform_6(%arg0: i32) -> (i32, i32) {
    %c0_i32 = arith.constant 0 : i32
    %c0_i32_0 = arith.constant 0 : i32
    %c0_i32_1 = arith.constant 0 : i32
    return %c0_i32, %c0_i32_0 : i32, i32
  }
  func.func @transform_7(%arg0: i32) -> (i32, i32) {
    %c0_i32 = arith.constant 0 : i32
    %c0_i32_0 = arith.constant 0 : i32
    %c0_i32_1 = arith.constant 0 : i32
    return %c0_i32, %c0_i32_0 : i32, i32
  }
  func.func @transform_8(%arg0: i32) -> (i32, i32) {
    %c0_i32 = arith.constant 0 : i32
    %c0_i32_0 = arith.constant 0 : i32
    %c0_i32_1 = arith.constant 0 : i32
    return %c0_i32, %c0_i32_0 : i32, i32
  }
  func.func @transform_9(%arg0: i32) -> (i32, i32) {
    %c0_i32 = arith.constant 0 : i32
    %c0_i32_0 = arith.constant 0 : i32
    %c0_i32_1 = arith.constant 0 : i32
    return %c0_i32, %c0_i32_0 : i32, i32
  }
  func.func @transform_10(%arg0: i32) -> (i32, i32) {
    %c0_i32 = arith.constant 0 : i32
    %c0_i32_0 = arith.constant 0 : i32
    %c0_i32_1 = arith.constant 0 : i32
    return %c0_i32, %c0_i32_0 : i32, i32
  }
  func.func @transform_11(%arg0: i32) -> (i32, i32) {
    %c0_i32 = arith.constant 0 : i32
    %c0_i32_0 = arith.constant 0 : i32
    %c0_i32_1 = arith.constant 0 : i32
    return %c0_i32, %c0_i32_0 : i32, i32
  }
  func.func @transform_12(%arg0: i32) -> (i32, i32) {
    %c0_i32 = arith.constant 0 : i32
    %c0_i32_0 = arith.constant 0 : i32
    %c0_i32_1 = arith.constant 0 : i32
    return %c0_i32, %c0_i32_0 : i32, i32
  }
  func.func @transform_13(%arg0: i32) -> (i32, i32) {
    %c0_i32 = arith.constant 0 : i32
    %c0_i32_0 = arith.constant 0 : i32
    return %c0_i32, %arg0 : i32, i32
  }
}

</mosaic_0001>

<bundles_post_ra>
// kernel: tpu_custom_call.1
= control target key start
LH: loop header
LB: loop body
LE: loop exit
PB: predicated region body
PF: predicated region fallthrough
CT: control target
= control target key end

     0   :  { %vm74_vm0 = vcmask 64512   ;;  %v745_v3 = vmov 0   ;;  %s1022_s0 = inlined_call_operand.vmem [shape: f32[8,16], index: 0, kind: input, shape index: {}]   ;;  %s1023_s1 = inlined_call_operand.vmem [shape: f32[32,8], index: 1, kind: input, shape index: {}]   ;;  %s1024_s2 = inlined_call_operand.vmem [shape: f32[32,1], index: 2, kind: input, shape index: {}]   ;;  %s1025_s3 = inlined_call_operand.vmem [shape: f32[32,32], index: 3, kind: input, shape index: {}]   ;;  %s1026_s4 = inlined_call_operand.vmem [shape: f32[32,1], index: 4, kind: input, shape index: {}]   ;;  %s1027_s5 = inlined_call_operand.vmem [shape: f32[32,32], index: 5, kind: input, shape index: {}]   ;;  %s1028_s6 = inlined_call_operand.vmem [shape: f32[32,1], index: 6, kind: input, shape index: {}]   ;;  %s1029_s7 = inlined_call_operand.vmem [shape: f32[5,32], index: 7, kind: input, shape index: {}]   ;;  %s1030_s8 = inlined_call_operand.vmem [shape: f32[5,1], index: 8, kind: input, shape index: {}]   ;;  %s1031_s9 = inlined_call_operand.vmem [shape: f32[5,5], index: 9, kind: input, shape index: {}]   ;;  %s1032_s10 = inlined_call_operand.vmem [shape: f32[6,5], index: 10, kind: input, shape index: {}]   ;;  %s1033_s11 = inlined_call_operand.vmem [shape: f32[5,1], index: 11, kind: input, shape index: {}]   ;;  %s1034_s12 = inlined_call_operand.vmem [shape: f32[6,1], index: 12, kind: input, shape index: {}]   ;;  %s1035_s13 = inlined_call_operand.hbm [shape: f32[6,16], index: 13, kind: output, shape index: {}]  }
   0x1   :  { %v45_v0 = vld [vmem:[%s1022_s0] sm:$0xff]  ;;  %v53_v1 = vld [vmem:[%s1024_s2 + $0x18] sm:$0xff]  ;;  %662 = vset.pattern.permute.xlu0 %v745_v3  ;;  %v51_v4 = vld [vmem:[%s1024_s2 + $0x8] sm:$0xff]  ;;  %663 = vset.pattern.permute.xlu1 %v745_v3 }
   0x2   :  { %v46_v2 = vld [vmem:[%s1023_s1] sm:$0xff]  ;;  %102 = vmatpush.msra.mxu0 %v45_v0  ;;  %71 = vperm.xlu0 %662, %v53_v1  }
   0x3   :  { %630 = vmatmul.msk.f32.vlgmr.msra.gmra.mxu0 %vm74_vm0, %v46_v2  ;;  %61 = vperm.xlu1 %663, %v51_v4  }
   0x4   :  { %664 = vset.pattern.permute.xlu2 %v745_v3 }
   0x5   :  { %18 = vsyncpa [#allocation3], 0  ;;  %v52_v5 = vld [vmem:[%s1024_s2 + $0x10] sm:$0xff]  ;;  %v47_v6 = vld [vmem:[%s1023_s1 + $0x8] sm:$0xff]  ;;  %s621_s20 = sshll.u32 %s1035_s13, 4  ;;  %s622_s20 = int_to_ptr.hbm [resolvable:$true] %s621_s20 }
   0x6   :  { %v50_v7 = vld [vmem:[%s1024_s2] sm:$0xff]  ;;  %v197_v8 = vld [vmem:[%s1026_s4 + $0x8] sm:$0xff]  ;;  %v48_v9 = vld [vmem:[%s1023_s1 + $0x10] sm:$0xff] }
   0x7   :  { %v196_v10 = vld [vmem:[%s1026_s4] sm:$0xff]  ;;  %v344_v11 = vld [vmem:[%s1028_s6 + $0x10] sm:$0xff]  ;;  %v49_v12 = vld [vmem:[%s1023_s1 + $0x18] sm:$0xff] }
   0x8   :  { %v343_v13 = vld [vmem:[%s1028_s6 + $0x8] sm:$0xff]  ;;  %v484_v14 = vld [vmem:[%s1030_s8] sm:$0x1f]  ;;  %v199_v53 = vld [vmem:[%s1026_s4 + $0x18] sm:$0xff] }
   0x9   :  { %v866_v15 = vld [vmem:[%s1033_s11] sm:$0x1f]  ;;  %217 = vperm.xlu2 %664, %v199_v53   ;;  %s746_s11 = smov [#allocation2]  }
   0xa   :  { %66 = vperm.xlu0 %662, %v52_v5   ;;  %v580_v16 = vld [vmem:[%s1034_s12] sm:$0x3f]  ;;  %s619_s12 = sshll.u32 %s746_s11, 4  ;;  %s620_s12 = int_to_ptr.vmem [resolvable:$true] %s619_s12 }
   0xb   :  { %631 = vmatmul.msk.f32.gmra.mxu0 %vm74_vm0, %v47_v6  ;;  %56 = vperm.xlu1 %663, %v50_v7  }
  0x12   :  { %207 = vperm.xlu0 %662, %v197_v8  }
  0x13   :  { %632 = vmatmul.msk.f32.gmra.mxu0 %vm74_vm0, %v48_v9  ;;  %202 = vperm.xlu1 %663, %v196_v10  }
  0x1a   :  { %358 = vperm.xlu0 %662, %v344_v11  }
  0x1b   :  { %633 = vmatmul.msk.f32.gmra.mxu0 %vm74_vm0, %v49_v12  ;;  %353 = vperm.xlu1 %663, %v343_v13   ;;  %v198_v12 = vld [vmem:[%s1026_s4 + $0x10] sm:$0xff] }
  0x1c   :  { %212 = vperm.xlu2 %664, %v198_v12  }
  0x22   :  { %487 = vperm.xlu0 %662, %v484_v14  }
  0x23   :  { %516 = vperm.xlu1 %663, %v866_v15  }
  0x2a   :  { %583 = vperm.xlu0 %662, %v580_v16  }
  0x74   :  { %v72_v19 = vpop.permute.xlu0 %71 }
  0x75   :  { %v62_v17 = vpop.permute.xlu1 %61 }
  0x7c   :  { %v67_v26 = vpop.permute.xlu0 %66 }
  0x7d   :  { %v57_v21 = vpop.permute.xlu1 %56 }
  0x80   :  { %v104_v18 = vpop.f32.mrf.mxu0 }
  0x81   :  { %v105_v23 = vadd.f32 %v104_v18, %v57_v21  ;;  %v192_v21 = vld [vmem:[%s1025_s3] sm:$0xff] }
  0x83   :  { %v634_v25 = vmul.f32 -1.442695, %v105_v23  ;;  %v345_v23 = vld [vmem:[%s1028_s6 + $0x18] sm:$0xff] }
  0x84   :  { %363 = vperm.xlu2 %664, %v345_v23  }
  0x88   :  { %v107_v20 = vpop.f32.mrf.mxu0 }
  0x89   :  { %v108_v22 = vadd.f32 %v107_v20, %v62_v17 }
  0x8b   :  { %v635_v24 = vmul.f32 -1.442695, %v108_v22 }
  0x8d   :  { %665 = vpow2.f32 %v635_v24  ;;  %v193_v24 = vld [vmem:[%s1025_s3 + $0x8] sm:$0xff] }
  0x8e   :  { %667 = vpow2.f32 %v634_v25  ;;  %v342_v25 = vld [vmem:[%s1028_s6] sm:$0xff] }
  0x8f   :  { %348 = vperm.xlu2 %664, %v342_v25  }
  0x90   :  { %v110_v27 = vpop.f32.mrf.mxu0 }
  0x91   :  { %v111_v28 = vadd.f32 %v110_v27, %v67_v26  ;;  %v520_v26 = vsub.f32 1.0, %v866_v15  ;;  %v194_v27 = vld [vmem:[%s1025_s3 + $0x10] sm:$0xff] }
  0x93   :  { %v636_v29 = vmul.f32 -1.442695, %v111_v28  ;;  %v666_v30 = vpop.eup %665  ;;  %v195_v28 = vld [vmem:[%s1025_s3 + $0x18] sm:$0xff] }
  0x94   :  { %v668_v31 = vpop.eup %667  ;;  %v872_v32 = vadd.f32 1.0, %v666_v30  ;;  %v218_v30 = vpop.permute.xlu2 %217 }
  0x95   :  { %669 = vpow2.f32 %v636_v29  ;;  %v874_v36 = vadd.f32 1.0, %v668_v31  ;;  %v208_v31 = vpop.permute.xlu0 %207 }
  0x96   :  { %671 = vrcp.f32 %v872_v32  ;;  %vm152_vm9 = vweird.f32 %v872_v32  ;;  %v156_v3 = vand.u32 2147483647, %v872_v32  ;;  %v158_v4 = vand.u32 2147483648, %v872_v32 }
  0x97   :  { %v143_v11 = vand.u32 2147483648, %v874_v36  ;;  %vm137_vm13 = vweird.f32 %v874_v36  ;;  %v141_v14 = vand.u32 2147483647, %v874_v36  ;;  %526 = vperm.xlu2 %664, %v520_v26  }
  0x98   :  { %v113_v33 = vpop.f32.mrf.mxu0  ;;  %v159_v17 = vor.u32 1.1754944e-38, %v158_v4  ;;  %vm157_vm15 = vcmp.eq.f32.partialorder %v156_v3, 8.507059e+37 }
  0x99   :  { %v114_v34 = vadd.f32 %v113_v33, %v72_v19  ;;  %v144_v20 = vor.u32 1.1754944e-38, %v143_v11  ;;  %vm142_vm0 = vcmp.eq.f32.partialorder %v141_v14, 8.507059e+37  ;;  %v203_v33 = vpop.permute.xlu1 %202 }
  0x9b   :  { %v670_v35 = vpop.eup %669  ;;  %v637_v37 = vmul.f32 -1.442695, %v114_v34 }
  0x9c   :  { %v130_v38 = vadd.f32 1.0, %v670_v35  ;;  %v878_v39 = vpop.eup %671 }
  0x9d   :  { %673 = vpow2.f32 %v637_v37  ;;  %v148_v45 = vmul.f32 %v878_v39, %v872_v32  ;;  %vm153_vm4 = vweird.f32 %v878_v39  ;;  %v213_v37 = vpop.permute.xlu2 %212 }
  0x9e   :  { %675 = vrcp.f32 %v130_v38  ;;  %vm167_vm3 = vweird.f32 %v130_v38  ;;  %v173_v61 = vand.u32 2147483648, %v130_v38  ;;  %v171_v0 = vand.u32 2147483647, %v130_v38  ;;  %vm906_vm11 = vmor %vm152_vm9, %vm153_vm4 }
  0x9f   :  { %677 = vrcp.f32 %v874_v36  ;;  %v149_v48 = vsub.f32 1.0, %v148_v45 }
  0xa0   :  { %v174_v9 = vor.u32 1.1754944e-38, %v173_v61  ;;  %vm172_vm12 = vcmp.eq.f32.partialorder %v171_v0, 8.507059e+37 }
  0xa1   :  { %v150_v55 = vmul.f32 %v878_v39, %v149_v48 }
  0xa3   :  { %v674_v40 = vpop.eup %673  ;;  %v151_v1 = vadd.f32 %v878_v39, %v150_v55 }
  0xa4   :  { %v676_v41 = vpop.eup %675  ;;  %v131_v42 = vadd.f32 1.0, %v674_v40 }
  0xa5   :  { %v880_v43 = vpop.eup %677  ;;  %v163_v44 = vmul.f32 %v676_v41, %v130_v38  ;;  %vm168_vm1 = vweird.f32 %v676_v41  ;;  %v155_v13 = vsel %vm906_vm11, %v878_v39, %v151_v1 }
  0xa6   :  { %679 = vrcp.f32 %v131_v42  ;;  %v133_v46 = vmul.f32 %v880_v43, %v874_v36  ;;  %v188_v56 = vand.u32 2147483648, %v131_v42  ;;  %v186_v59 = vand.u32 2147483647, %v131_v42  ;;  %vm893_vm7 = vmor %vm167_vm3, %vm168_vm1 }
  0xa7   :  { %v164_v47 = vsub.f32 1.0, %v163_v44  ;;  %vm138_vm5 = vweird.f32 %v880_v43  ;;  %vm182_vm6 = vweird.f32 %v131_v42  ;;  %v160_v19 = vsel %vm157_vm15, %v159_v17, %v155_v13 }
  0xa8   :  { %v134_v50 = vsub.f32 1.0, %v133_v46  ;;  %v189_v2 = vor.u32 1.1754944e-38, %v188_v56  ;;  %vm187_vm10 = vcmp.eq.f32.partialorder %v186_v59, 8.507059e+37  ;;  %vm139_vm14 = vmor %vm137_vm13, %vm138_vm5  ;;  %vm220_vm1 = vcmask 261120  }
  0xa9   :  { %v165_v52 = vmul.f32 %v676_v41, %v164_v47 }
  0xaa   :  { %v135_v57 = vmul.f32 %v880_v43, %v134_v50 }
  0xab   :  { %v166_v60 = vadd.f32 %v676_v41, %v165_v52 }
  0xac   :  { %v680_v49 = vpop.eup %679  ;;  %v136_v7 = vadd.f32 %v880_v43, %v135_v57 }
  0xad   :  { %v178_v51 = vmul.f32 %v680_v49, %v131_v42  ;;  %vm183_vm2 = vweird.f32 %v680_v49  ;;  %v170_v6 = vsel %vm893_vm7, %v676_v41, %v166_v60 }
  0xae   :  { %vm184_vm8 = vmor %vm182_vm6, %vm183_vm2  ;;  %v175_v16 = vsel %vm172_vm12, %v174_v9, %v170_v6  ;;  %v140_v18 = vsel %vm139_vm14, %v880_v43, %v136_v7 }
  0xaf   :  { %v179_v54 = vsub.f32 1.0, %v178_v51  ;;  %v145_v22 = vsel %vm142_vm0, %v144_v20, %v140_v18 }
  0xb1   :  { %v180_v58 = vmul.f32 %v680_v49, %v179_v54 }
  0xb3   :  { %v181_v62 = vadd.f32 %v680_v49, %v180_v58 }
  0xb5   :  { %v185_v5 = vsel %vm184_vm8, %v680_v49, %v181_v62 }
  0xb6   :  { %v190_v8 = vsel %vm187_vm10, %v189_v2, %v185_v5 }
  0xb7   :  { %245 = vmatpush.msra.mxu1 %v190_v8 }
  0xb9   :  { %246 = vmatpush.msra.mxu1 %v175_v16 }
  0xbb   :  { %247 = vmatpush.msra.mxu1 %v160_v19 }
  0xbd   :  { %248 = vmatpush.msra.mxu1 %v145_v22 }
  0xbe   :  { %638 = vmatmul.msk.f32.vlgmr.msra.gmra.mxu1 %vm220_vm1, %v192_v21 }
  0xc6   :  { %639 = vmatmul.msk.f32.gmra.mxu1 %vm220_vm1, %v193_v24 }
  0xce   :  { %640 = vmatmul.msk.f32.gmra.mxu1 %vm220_vm1, %v194_v27 }
  0xd6   :  { %641 = vmatmul.msk.f32.gmra.mxu1 %vm220_vm1, %v195_v28 }
 0x13b   :  { %v250_v29 = vpop.f32.mrf.mxu1 }
 0x13c   :  { %v251_v15 = vadd.f32 %v250_v29, %v203_v33  ;;  %v338_v29 = vld [vmem:[%s1027_s5] sm:$0xff]  ;;  %v341_v33 = vld [vmem:[%s1027_s5 + $0x18] sm:$0xff] }
 0x13e   :  { %v642_v36 = vmul.f32 -1.442695, %v251_v15 }
 0x143   :  { %v253_v32 = vpop.f32.mrf.mxu1 }
 0x144   :  { %v254_v34 = vadd.f32 %v253_v32, %v208_v31  ;;  %v339_v31 = vld [vmem:[%s1027_s5 + $0x8] sm:$0xff]  ;;  %v340_v32 = vld [vmem:[%s1027_s5 + $0x10] sm:$0xff] }
 0x146   :  { %v643_v35 = vmul.f32 -1.442695, %v254_v34  ;;  %v364_v34 = vpop.permute.xlu2 %363 }
 0x148   :  { %681 = vpow2.f32 %v643_v35  ;;  %v354_v35 = vpop.permute.xlu1 %353 }
 0x149   :  { %683 = vpow2.f32 %v642_v36 }
 0x14b   :  { %v256_v38 = vpop.f32.mrf.mxu1 }
 0x14c   :  { %v257_v39 = vadd.f32 %v256_v38, %v213_v37 }
 0x14e   :  { %v644_v40 = vmul.f32 -1.442695, %v257_v39  ;;  %v682_v41 = vpop.eup %681  ;;  %v349_v37 = vpop.permute.xlu2 %348 }
 0x14f   :  { %v684_v42 = vpop.eup %683  ;;  %v945_v43 = vadd.f32 1.0, %v682_v41 }
 0x150   :  { %685 = vpow2.f32 %v644_v40  ;;  %v947_v47 = vadd.f32 1.0, %v684_v42  ;;  %v359_v42 = vpop.permute.xlu0 %358 }
 0x151   :  { %687 = vrcp.f32 %v945_v43  ;;  %vm298_vm10 = vweird.f32 %v945_v43  ;;  %v302_v13 = vand.u32 2147483647, %v945_v43  ;;  %v304_v14 = vand.u32 2147483648, %v945_v43 }
 0x152   :  { %v289_v21 = vand.u32 2147483648, %v947_v47  ;;  %vm283_vm14 = vweird.f32 %v947_v47  ;;  %v287_v23 = vand.u32 2147483647, %v947_v47 }
 0x153   :  { %v259_v44 = vpop.f32.mrf.mxu1  ;;  %v305_v25 = vor.u32 1.1754944e-38, %v304_v14  ;;  %vm303_vm0 = vcmp.eq.f32.partialorder %v302_v13, 8.507059e+37 }
 0x154   :  { %v260_v45 = vadd.f32 %v259_v44, %v218_v30  ;;  %v290_v28 = vor.u32 1.1754944e-38, %v289_v21 }
 0x156   :  { %v686_v46 = vpop.eup %685  ;;  %v645_v48 = vmul.f32 -1.442695, %v260_v45 }
 0x157   :  { %v276_v49 = vadd.f32 1.0, %v686_v46  ;;  %v688_v50 = vpop.eup %687 }
 0x158   :  { %689 = vpow2.f32 %v645_v48  ;;  %v294_v56 = vmul.f32 %v688_v50, %v945_v43  ;;  %vm299_vm5 = vweird.f32 %v688_v50 }
 0x159   :  { %691 = vrcp.f32 %v276_v49  ;;  %vm313_vm4 = vweird.f32 %v276_v49  ;;  %v319_v7 = vand.u32 2147483648, %v276_v49  ;;  %v317_v10 = vand.u32 2147483647, %v276_v49  ;;  %vm300_vm12 = vmor %vm298_vm10, %vm299_vm5 }
 0x15a   :  { %693 = vrcp.f32 %v947_v47  ;;  %v295_v59 = vsub.f32 1.0, %v294_v56 }
 0x15b   :  { %v320_v20 = vor.u32 1.1754944e-38, %v319_v7  ;;  %vm318_vm13 = vcmp.eq.f32.partialorder %v317_v10, 8.507059e+37 }
 0x15c   :  { %v296_v1 = vmul.f32 %v688_v50, %v295_v59 }
 0x15e   :  { %v690_v51 = vpop.eup %689  ;;  %v297_v11 = vadd.f32 %v688_v50, %v296_v1 }
 0x15f   :  { %v692_v52 = vpop.eup %691  ;;  %v277_v53 = vadd.f32 1.0, %v690_v51 }
 0x160   :  { %v694_v54 = vpop.eup %693  ;;  %v309_v55 = vmul.f32 %v692_v52, %v276_v49  ;;  %vm314_vm2 = vweird.f32 %v692_v52  ;;  %v301_v22 = vsel %vm300_vm12, %v688_v50, %v297_v11 }
 0x161   :  { %695 = vrcp.f32 %v277_v53  ;;  %v279_v57 = vmul.f32 %v694_v54, %v947_v47  ;;  %v334_v2 = vand.u32 2147483648, %v277_v53  ;;  %v332_v5 = vand.u32 2147483647, %v277_v53  ;;  %vm953_vm8 = vmor %vm313_vm4, %vm314_vm2 }
 0x162   :  { %v310_v58 = vsub.f32 1.0, %v309_v55  ;;  %vm284_vm6 = vweird.f32 %v694_v54  ;;  %vm328_vm7 = vweird.f32 %v277_v53  ;;  %v306_v27 = vsel %vm303_vm0, %v305_v25, %v301_v22 }
 0x163   :  { %v280_v61 = vsub.f32 1.0, %v279_v57  ;;  %v335_v12 = vor.u32 1.1754944e-38, %v334_v2  ;;  %vm333_vm11 = vcmp.eq.f32.partialorder %v332_v5, 8.507059e+37  ;;  %vm285_vm15 = vmor %vm283_vm14, %vm284_vm6  ;;  %vm288_vm2 = vcmp.eq.f32.partialorder %v287_v23, 8.507059e+37 }
 0x164   :  { %v311_v63 = vmul.f32 %v692_v52, %v310_v58 }
 0x165   :  { %v281_v3 = vmul.f32 %v694_v54, %v280_v61 }
 0x166   :  { %v312_v6 = vadd.f32 %v692_v52, %v311_v63 }
 0x167   :  { %v696_v60 = vpop.eup %695  ;;  %v282_v18 = vadd.f32 %v694_v54, %v281_v3 }
 0x168   :  { %v324_v62 = vmul.f32 %v696_v60, %v277_v53  ;;  %vm329_vm3 = vweird.f32 %v696_v60  ;;  %v316_v17 = vsel %vm953_vm8, %v692_v52, %v312_v6 }
 0x169   :  { %vm330_vm9 = vmor %vm328_vm7, %vm329_vm3  ;;  %v321_v24 = vsel %vm318_vm13, %v320_v20, %v316_v17  ;;  %v286_v26 = vsel %vm285_vm15, %v694_v54, %v282_v18 }
 0x16a   :  { %v325_v0 = vsub.f32 1.0, %v324_v62  ;;  %v291_v30 = vsel %vm288_vm2, %v290_v28, %v286_v26 }
 0x16c   :  { %v326_v4 = vmul.f32 %v696_v60, %v325_v0 }
 0x16e   :  { %v327_v8 = vadd.f32 %v696_v60, %v326_v4 }
 0x170   :  { %v331_v16 = vsel %vm330_vm9, %v696_v60, %v327_v8 }
 0x171   :  { %v336_v19 = vsel %vm333_vm11, %v335_v12, %v331_v16 }
 0x172   :  { %390 = vmatpush.msra.mxu2 %v336_v19 }
 0x174   :  { %391 = vmatpush.msra.mxu2 %v321_v24 }
 0x176   :  { %392 = vmatpush.msra.mxu2 %v306_v27 }
 0x178   :  { %393 = vmatpush.msra.mxu2 %v291_v30 }
 0x179   :  { %646 = vmatmul.msk.f32.vlgmr.msra.gmra.mxu2 %vm220_vm1, %v338_v29 }
 0x181   :  { %647 = vmatmul.msk.f32.gmra.mxu2 %vm220_vm1, %v339_v31 }
 0x189   :  { %648 = vmatmul.msk.f32.gmra.mxu2 %vm220_vm1, %v340_v32 }
 0x191   :  { %649 = vmatmul.msk.f32.gmra.mxu2 %vm220_vm1, %v341_v33 }
 0x1fc   :  { %v395_v15 = vpop.f32.mrf.mxu2 }
 0x1fd   :  { %v396_v39 = vadd.f32 %v395_v15, %v349_v37 }
 0x1ff   :  { %v650_v41 = vmul.f32 -1.442695, %v396_v39 }
 0x204   :  { %v398_v36 = vpop.f32.mrf.mxu2 }
 0x205   :  { %v399_v38 = vadd.f32 %v398_v36, %v354_v35  ;;  %v488_v35 = vpop.permute.xlu0 %487 }
 0x207   :  { %v651_v40 = vmul.f32 -1.442695, %v399_v38 }
 0x209   :  { %697 = vpow2.f32 %v651_v40 }
 0x20a   :  { %699 = vpow2.f32 %v650_v41  ;;  %v517_v41 = vpop.permute.xlu1 %516 }
 0x20c   :  { %v401_v43 = vpop.f32.mrf.mxu2 }
 0x20d   :  { %v402_v44 = vadd.f32 %v401_v43, %v359_v42  ;;  %v527_v42 = vpop.permute.xlu2 %526 }
 0x20f   :  { %v652_v45 = vmul.f32 -1.442695, %v402_v44  ;;  %v698_v46 = vpop.eup %697 }
 0x210   :  { %v700_v47 = vpop.eup %699  ;;  %v983_v48 = vadd.f32 1.0, %v698_v46  ;;  %v531_v46 = vld [vmem:[%s1031_s9] sm:$0x1f] }
 0x211   :  { %701 = vpow2.f32 %v652_v45  ;;  %v985_v52 = vadd.f32 1.0, %v700_v47 }
 0x212   :  { %703 = vrcp.f32 %v983_v48  ;;  %vm443_vm11 = vweird.f32 %v983_v48  ;;  %v447_v19 = vand.u32 2147483647, %v983_v48  ;;  %v449_v20 = vand.u32 2147483648, %v983_v48 }
 0x213   :  { %v434_v26 = vand.u32 2147483648, %v985_v52  ;;  %vm428_vm15 = vweird.f32 %v985_v52  ;;  %v432_v28 = vand.u32 2147483647, %v985_v52 }
 0x214   :  { %v404_v49 = vpop.f32.mrf.mxu2  ;;  %v450_v30 = vor.u32 1.1754944e-38, %v449_v20  ;;  %vm448_vm2 = vcmp.eq.f32.partialorder %v447_v19, 8.507059e+37 }
 0x215   :  { %v405_v50 = vadd.f32 %v404_v49, %v364_v34  ;;  %v435_v33 = vor.u32 1.1754944e-38, %v434_v26  ;;  %v483_v34 = vld [vmem:[%s1029_s7] sm:$0x1f] }
 0x217   :  { %v702_v51 = vpop.eup %701  ;;  %v653_v53 = vmul.f32 -1.442695, %v405_v50 }
 0x218   :  { %v421_v54 = vadd.f32 1.0, %v702_v51  ;;  %v704_v55 = vpop.eup %703 }
 0x219   :  { %705 = vpow2.f32 %v653_v53  ;;  %v439_v61 = vmul.f32 %v704_v55, %v983_v48  ;;  %vm444_vm6 = vweird.f32 %v704_v55 }
 0x21a   :  { %707 = vrcp.f32 %v421_v54  ;;  %vm458_vm5 = vweird.f32 %v421_v54  ;;  %v464_v12 = vand.u32 2147483648, %v421_v54  ;;  %v462_v16 = vand.u32 2147483647, %v421_v54  ;;  %vm445_vm13 = vmor %vm443_vm11, %vm444_vm6 }
 0x21b   :  { %709 = vrcp.f32 %v985_v52  ;;  %v440_v0 = vsub.f32 1.0, %v439_v61 }
 0x21c   :  { %v465_v25 = vor.u32 1.1754944e-38, %v464_v12  ;;  %vm463_vm14 = vcmp.eq.f32.partialorder %v462_v16, 8.507059e+37 }
 0x21d   :  { %v441_v6 = vmul.f32 %v704_v55, %v440_v0 }
 0x21f   :  { %v706_v56 = vpop.eup %705  ;;  %v442_v17 = vadd.f32 %v704_v55, %v441_v6 }
 0x220   :  { %v708_v57 = vpop.eup %707  ;;  %v422_v58 = vadd.f32 1.0, %v706_v56 }
 0x221   :  { %v710_v59 = vpop.eup %709  ;;  %v454_v60 = vmul.f32 %v708_v57, %v421_v54  ;;  %vm459_vm3 = vweird.f32 %v708_v57  ;;  %v446_v27 = vsel %vm445_vm13, %v704_v55, %v442_v17 }
 0x222   :  { %711 = vrcp.f32 %v422_v58  ;;  %v424_v62 = vmul.f32 %v710_v59, %v985_v52  ;;  %v479_v7 = vand.u32 2147483648, %v422_v58  ;;  %v477_v10 = vand.u32 2147483647, %v422_v58  ;;  %vm991_vm9 = vmor %vm458_vm5, %vm459_vm3 }
 0x223   :  { %v455_v63 = vsub.f32 1.0, %v454_v60  ;;  %vm429_vm7 = vweird.f32 %v710_v59  ;;  %vm473_vm8 = vweird.f32 %v422_v58  ;;  %v451_v32 = vsel %vm448_vm2, %v450_v30, %v446_v27  ;;  %v579_v60 = vld [vmem:[%s1032_s10] sm:$0x3f] }
 0x224   :  { %v425_v2 = vsub.f32 1.0, %v424_v62  ;;  %v480_v18 = vor.u32 1.1754944e-38, %v479_v7  ;;  %vm478_vm12 = vcmp.eq.f32.partialorder %v477_v10, 8.507059e+37  ;;  %vm430_vm0 = vmor %vm428_vm15, %vm429_vm7  ;;  %vm433_vm3 = vcmp.eq.f32.partialorder %v432_v28, 8.507059e+37  ;;  %v584_v62 = vpop.permute.xlu0 %583 }
 0x225   :  { %v456_v4 = vmul.f32 %v708_v57, %v455_v63  ;;  %vm532_vm5 = vcmask 39936  }
 0x226   :  { %v426_v8 = vmul.f32 %v710_v59, %v425_v2 }
 0x227   :  { %v457_v11 = vadd.f32 %v708_v57, %v456_v4 }
 0x228   :  { %v712_v1 = vpop.eup %711  ;;  %v427_v23 = vadd.f32 %v710_v59, %v426_v8 }
 0x229   :  { %v469_v3 = vmul.f32 %v712_v1, %v422_v58  ;;  %vm474_vm4 = vweird.f32 %v712_v1  ;;  %v461_v22 = vsel %vm991_vm9, %v708_v57, %v457_v11  ;;  %vm612_vm9 = vcmask 128000  }
 0x22a   :  { %vm475_vm10 = vmor %vm473_vm8, %vm474_vm4  ;;  %v466_v29 = vsel %vm463_vm14, %v465_v25, %v461_v22  ;;  %v431_v31 = vsel %vm430_vm0, %v710_v59, %v427_v23  ;;  %vm536_vm4 = vcmask 1044480  }
 0x22b   :  { %v470_v5 = vsub.f32 1.0, %v469_v3  ;;  %v436_v15 = vsel %vm433_vm3, %v435_v33, %v431_v31 }
 0x22d   :  { %v471_v9 = vmul.f32 %v712_v1, %v470_v5 }
 0x22f   :  { %v472_v13 = vadd.f32 %v712_v1, %v471_v9 }
 0x231   :  { %v476_v21 = vsel %vm475_vm10, %v712_v1, %v472_v13 }
 0x232   :  { %v481_v24 = vsel %vm478_vm12, %v480_v18, %v476_v21 }
 0x233   :  { %505 = vmatpush.msra.mxu3 %v481_v24 }
 0x235   :  { %506 = vmatpush.msra.mxu3 %v466_v29 }
 0x237   :  { %507 = vmatpush.msra.mxu3 %v451_v32 }
 0x239   :  { %508 = vmatpush.msra.mxu3 %v436_v15 }
 0x23a   :  { %654 = vmatmul.msk.f32.vlgmr.msra.gmra.mxu3 %vm220_vm1, %v483_v34 }
 0x2bd   :  { %v510_v36 = vpop.f32.mrf.mxu3 }
 0x2be   :  { %v511_v37 = vadd.f32 %v510_v36, %v488_v35 }
 0x2c0   :  { %v521_v38 = vmin.f32 %v511_v37, 80.0  ;;  %v519_v43 = vmul.f32 %v517_v41, %v511_v37 }
 0x2c2   :  { %v522_v39 = vmul.f32 1.442695, %v521_v38 }
 0x2c4   :  { %713 = vpow2.f32 %v522_v39 }
 0x2ca   :  { %v714_v40 = vpop.eup %713 }
 0x2cb   :  { %v529_v44 = vmul.f32 %v714_v40, %v527_v42 }
 0x2cd   :  { %v530_v45 = vadd.f32 %v529_v44, %v519_v43 }
 0x2cf   :  { %655 = vmatpush.msk.msrb.mxu3 %vm536_vm4, %v530_v45 }
 0x2d0   :  { %656 = vmatmul.msk.f32.vlgmr.msrb.gmra.mxu3 %vm532_vm5, %v531_v46 }
 0x353   :  { %v557_v47 = vpop.f32.mrf.mxu3 }
 0x354   :  { %v657_v48 = vmul.f32 -1.442695, %v557_v47 }
 0x356   :  { %715 = vpow2.f32 %v657_v48 }
 0x35c   :  { %v716_v49 = vpop.eup %715 }
 0x35d   :  { %v563_v50 = vadd.f32 1.0, %v716_v49 }
 0x35f   :  { %717 = vrcp.f32 %v563_v50  ;;  %v575_v54 = vand.u32 2147483648, %v563_v50  ;;  %v573_v56 = vand.u32 2147483647, %v563_v50  ;;  %vm569_vm6 = vweird.f32 %v563_v50 }
 0x361   :  { %v576_v58 = vor.u32 1.1754944e-38, %v575_v54  ;;  %vm574_vm8 = vcmp.eq.f32.partialorder %v573_v56, 8.507059e+37 }
 0x365   :  { %v718_v51 = vpop.eup %717 }
 0x366   :  { %v565_v52 = vmul.f32 %v718_v51, %v563_v50  ;;  %vm570_vm1 = vweird.f32 %v718_v51 }
 0x367   :  { %vm571_vm7 = vmor %vm569_vm6, %vm570_vm1 }
 0x368   :  { %v566_v53 = vsub.f32 1.0, %v565_v52 }
 0x36a   :  { %v567_v55 = vmul.f32 %v718_v51, %v566_v53 }
 0x36c   :  { %v568_v57 = vadd.f32 %v718_v51, %v567_v55 }
 0x36e   :  { %v572_v59 = vsel %vm571_vm7, %v718_v51, %v568_v57 }
 0x36f   :  { %v577_v61 = vsel %vm574_vm8, %v576_v58, %v572_v59 }
 0x370   :  { %658 = vmatpush.msk.msra.mxu3 %vm536_vm4, %v577_v61 }
 0x371   :  { %659 = vmatmul.msk.f32.vlgmr.msra.gmra.mxu3 %vm532_vm5, %v579_v60 }
 0x3f4   :  { %v609_v63 = vpop.f32.mrf.mxu3 }
 0x3f5   :  { %v610_v0 = vadd.f32 %v609_v63, %v584_v62 }
 0x3f7   :  { %613 = vst.msk [vmem:[#allocation2] sm:$0x3f] %vm612_vm9, %v610_v0 }
 0x3f8   :  { %624 = dma.vmem_to_hbm [thread:$0]  %s620_s12, 128, %s622_s20, [#allocation3]  }
 0x3f9   :  { %743 = dma.done.wait [#allocation3], 128  }
 0x3fa   :  { %744 = vsyncadd [#allocation3], 4294967168 }
 0x3fb   :  { %629 = vsyncpa [#allocation3], 1 }

</bundles_post_ra>
